<compile_context>
chip_gen: v5e
topology: v5e:2x2
jax: 0.10.0
libtpu: 0.0.40
codegen_flags: <defaults>
</compile_context>

<pallas_src>
import functools

import jax
import jax.numpy as jnp
from jax.experimental import pallas as pl
from jax.experimental.pallas import tpu as pltpu


def _round_up(n, m):
    return ((n + m - 1) // m) * m


def _tpu_kind():
    try:
        d = jax.devices()[0]
        if d.platform == "tpu":
            return d.device_kind.lower()
    except Exception:
        pass
    return ""


def _mlp_kernel(x_ref, w1t_ref, b1_ref, w2_ref, b2_ref, o_ref, *, elem_dtype):
    # x:   (TB, E) input-dtype tile      w1t: (E, E) bf16, resident (pre-transposed)
    # b1:  (1, E)  f32, resident         w2:  (1, E) elem_dtype, resident
    # b2:  (1, 1)  f32 scalar in SMEM    o:   (1, TB) f32 lane-dense tile
    # In-kernel bf16 cast (no separate HBM cast pass in the wrapper).
    x = x_ref[...].astype(jnp.bfloat16)
    # linear1 on the MXU with f32 accumulation (no in-kernel transpose).
    h = jnp.dot(x, w1t_ref[...], preferred_element_type=jnp.float32)
    # bias + sigmoid; elementwise path is bf16 on v6e/v7x, f32 on v5e.
    h = (h + b1_ref[...]).astype(elem_dtype)
    # sigmoid(x) == 0.5 * tanh(0.5 * x) + 0.5  -> single EUP op (no exp + recip).
    s = 0.5 * jnp.tanh(0.5 * h) + 0.5
    # linear2 (out_features == 1): VPU multiply + cross-lane reduce, f32 accumulate.
    prod = (s * w2_ref[...]).astype(jnp.float32)
    out = jnp.sum(prod, axis=-1) + b2_ref[0, 0]          # (TB,) f32
    # Lane-dense store: (TB,) -> (1, TB) so the writeback DMA is unmasked vst.
    o_ref[...] = out.reshape(1, -1).astype(o_ref.dtype)


def mlp_forward(x, w1, b1, w2, b2, *, block_b=None):
    """Pallas implementation of MLP.forward.

    x: (B, E) -> rating: (B,)   (torch.squeeze semantics on the (B, 1) output).
    w1: (E, E), b1: (E,), w2: (1, E), b2: (1,)  -- PyTorch nn.Linear layout.
    """
    x = jnp.asarray(x)
    B, E = x.shape

    kind = _tpu_kind()
    is_v5 = "v5" in kind
    is_v7 = "v7" in kind

    # v5e has no bf16 VPU/EUP path -> keep elementwise math in f32 there.
    elem_dtype = jnp.float32 if is_v5 else jnp.bfloat16

    # Batch tile: big enough to amortize per-grid-step overhead (~0.35 us),
    # capped on v7x (64 MiB VMEM, 2 TensorCores want >= 2 tiles each).
    if block_b is None:
        block_b = 1024 if is_v7 else 2048
    tb = min(int(block_b), _round_up(B, 256))
    tb = max(128, _round_up(tb, 128))          # lane-aligned output blocks

    num_tiles = pl.cdiv(B, tb)
    padded_b = num_tiles * tb

    # One-time weight prep OUTSIDE the kernel (constant-folded under jit when
    # the weights are static across calls).
    w1_t = jnp.asarray(w1, jnp.float32).T.astype(jnp.bfloat16)      # (E, E)
    b1_r = jnp.asarray(b1, jnp.float32).reshape(1, E)
    w2_r = jnp.asarray(w2, jnp.float32).astype(elem_dtype).reshape(1, E)
    b2_r = jnp.asarray(b2, jnp.float32).reshape(1, 1)

    kernel = functools.partial(_mlp_kernel, elem_dtype=elem_dtype)

    cost = pl.CostEstimate(
        flops=2 * B * E * E + 4 * B * E,
        transcendentals=B * E,
        bytes_accessed=B * E * x.dtype.itemsize + E * E * 2 + (2 * E + 2) * 4
        + padded_b * 4,
    )

    # Scoped-VMEM ceiling: leave headroom above the double-buffered x tiles +
    # resident weights + elementwise temps.  Keep it below v7x's 64 MiB VMEM.
    vmem_cap = (48 << 20) if is_v7 else (100 << 20)

    # NOTE: for very large E (>= 2048) on v7x, add pipeline_mode=pl.Buffered(1)
    # to the w1_t BlockSpec (constant-index input) to avoid double-buffering an
    # 8+ MiB weight; unnecessary at E <= 1024.
    out = pl.pallas_call(
        kernel,
        out_shape=jax.ShapeDtypeStruct((1, padded_b), jnp.float32),
        grid=(num_tiles,),
        in_specs=[
            pl.BlockSpec((tb, E), lambda i: (i, 0)),            # x tile, pipelined
            pl.BlockSpec((E, E), lambda i: (0, 0)),             # w1^T, resident
            pl.BlockSpec((1, E), lambda i: (0, 0)),             # b1,   resident
            pl.BlockSpec((1, E), lambda i: (0, 0)),             # w2,   resident
            pl.BlockSpec(memory_space=pltpu.MemorySpace.SMEM),  # b2 scalar
        ],
        out_specs=pl.BlockSpec((1, tb), lambda i: (0, i)),      # lane-dense output
        compiler_params=pltpu.CompilerParams(
            dimension_semantics=("parallel",),
            vmem_limit_bytes=vmem_cap,
        ),
        cost_estimate=cost,
    )(x, w1_t, b1_r, w2_r, b2_r)

    # Tail rows of a partial last input block are garbage -> slice them off
    # BEFORE any reduction.  torch.squeeze removes the size-1 feature dim.
    return jnp.squeeze(out.reshape(-1)[:B])


def init_params(key, emsize):
    """Deterministic init mirroring MLP.init_weights (uniform(-0.1, 0.1), zero bias)."""
    k1, k2 = jax.random.split(key)
    initrange = 0.1
    w1 = jax.random.uniform(k1, (emsize, emsize), jnp.float32, -initrange, initrange)
    b1 = jnp.zeros((emsize,), jnp.float32)
    w2 = jax.random.uniform(k2, (1, emsize), jnp.float32, -initrange, initrange)
    b2 = jnp.zeros((1,), jnp.float32)
    return w1, b1, w2, b2


def _reference(x, w1, b1, w2, b2):
    return jnp.squeeze(jax.nn.sigmoid(x @ w1.T + b1) @ w2.T + b2)


if __name__ == "__main__":
    key = jax.random.PRNGKey(0)
    k_x, k_p, k_x2, k_b1, k_b2 = jax.random.split(key, 5)

    emsize = 128   # small stand-in for the default 512
    batch = 256

    x = jax.random.normal(k_x, (batch, emsize), jnp.float32)
    w1, b1, w2, b2 = init_params(k_p, emsize)

    # Explicit tile of 128 -> 2 grid steps, exercises the batch pipeline.
    rating = mlp_forward(x, w1, b1, w2, b2, block_b=128)
    jax.block_until_ready(rating)
    ref = _reference(x, w1, b1, w2, b2)
    assert rating.shape == (batch,)
    # bf16 MXU operands (+ bf16 elementwise on v6e/v7x) -> loose tolerance.
    assert jnp.allclose(rating, ref, atol=2e-2, rtol=0.0), float(
        jnp.max(jnp.abs(rating - ref))
    )

    # Ragged batch (partial last input block, no padding pass) + non-zero
    # biases, default (auto-selected) tile size.
    x2 = jax.random.normal(k_x2, (200, emsize), jnp.float32)
    b1_rand = 0.05 * jax.random.normal(k_b1, (emsize,), jnp.float32)
    b2_rand = 0.05 * jax.random.normal(k_b2, (1,), jnp.float32)
    rating2 = mlp_forward(x2, w1, b1_rand, w2, b2_rand)
    jax.block_until_ready(rating2)
    ref2 = _reference(x2, w1, b1_rand, w2, b2_rand)
    assert rating2.shape == (200,)
    assert jnp.allclose(rating2, ref2, atol=2e-2, rtol=0.0), float(
        jnp.max(jnp.abs(rating2 - ref2))
    )

    print("KERNEL_OK")
</pallas_src>

<mosaic_0001>
module attributes {stable_mosaic.version = 11 : i64} {
  func.func @_mlp_kernel(%arg0: i32, %arg1: memref<128x128xf32, #tpu.memory_space<vmem>>, %arg2: memref<128x128xbf16, #tpu.memory_space<vmem>>, %arg3: memref<1x128xf32, #tpu.memory_space<vmem>>, %arg4: memref<1x128xbf16, #tpu.memory_space<vmem>>, %arg5: memref<1x1xf32, #tpu.memory_space<smem>>, %arg6: memref<1x128xf32, #tpu.memory_space<vmem>>) attributes {dimension_semantics = [#tpu.dimension_semantics<parallel>], iteration_bounds = array<i64: 2>, scalar_prefetch = 0 : i64, scratch_operands = 0 : i64, tpu.core_type = #tpu.core_type<tc>, window_params = [{transform_indices = @transform_0, window_bounds = array<i64: 128, 128>}, {pipeline_mode = #tpu.pipeline_mode<synchronous>, transform_indices = @transform_1, window_bounds = array<i64: 128, 128>}, {pipeline_mode = #tpu.pipeline_mode<synchronous>, transform_indices = @transform_2, window_bounds = array<i64: 1, 128>}, {pipeline_mode = #tpu.pipeline_mode<synchronous>, transform_indices = @transform_3, window_bounds = array<i64: 1, 128>}, {transform_indices = @transform_4, window_bounds = array<i64: 1, 1>}, {transform_indices = @transform_5, window_bounds = array<i64: 1, 128>}]} {
    %c0 = arith.constant 0 : index
    %c0_0 = arith.constant 0 : index
    %0 = vector.load %arg1[%c0, %c0_0] : memref<128x128xf32, #tpu.memory_space<vmem>>, vector<128x128xf32>
    %1 = arith.truncf %0 : vector<128x128xf32> to vector<128x128xbf16>
    %c0_1 = arith.constant 0 : index
    %c0_2 = arith.constant 0 : index
    %2 = vector.load %arg2[%c0_1, %c0_2] : memref<128x128xbf16, #tpu.memory_space<vmem>>, vector<128x128xbf16>
    %cst = arith.constant dense<0.000000e+00> : vector<128x128xf32>
    %3 = tpu.matmul %1, %2, %cst {dimension_numbers = #tpu.dot_dimension_numbers<[1], [0], [0], [1], [0, 0, 1, 1], [], []>} : vector<128x128xbf16>, vector<128x128xbf16>, vector<128x128xf32> -> vector<128x128xf32>
    %c0_3 = arith.constant 0 : index
    %c0_4 = arith.constant 0 : index
    %4 = vector.load %arg3[%c0_3, %c0_4] : memref<1x128xf32, #tpu.memory_space<vmem>>, vector<1x128xf32>
    %5 = vector.broadcast %4 : vector<1x128xf32> to vector<128x128xf32>
    %6 = arith.addf %3, %5 : vector<128x128xf32>
    %7 = arith.truncf %6 : vector<128x128xf32> to vector<128x128xbf16>
    %cst_5 = arith.constant 5.000000e-01 : bf16
    %8 = vector.broadcast %cst_5 : bf16 to vector<128x128xbf16>
    %9 = arith.mulf %8, %7 : vector<128x128xbf16>
    %10 = math.tanh %9 : vector<128x128xbf16>
    %cst_6 = arith.constant 5.000000e-01 : bf16
    %11 = vector.broadcast %cst_6 : bf16 to vector<128x128xbf16>
    %12 = arith.mulf %11, %10 : vector<128x128xbf16>
    %cst_7 = arith.constant 5.000000e-01 : bf16
    %13 = vector.broadcast %cst_7 : bf16 to vector<128x128xbf16>
    %14 = arith.addf %12, %13 : vector<128x128xbf16>
    %c0_8 = arith.constant 0 : index
    %c0_9 = arith.constant 0 : index
    %15 = vector.load %arg4[%c0_8, %c0_9] : memref<1x128xbf16, #tpu.memory_space<vmem>>, vector<1x128xbf16>
    %16 = vector.broadcast %15 : vector<1x128xbf16> to vector<128x128xbf16>
    %17 = arith.mulf %14, %16 : vector<128x128xbf16>
    %18 = arith.extf %17 : vector<128x128xbf16> to vector<128x128xf32>
    %cst_10 = arith.constant dense<0.000000e+00> : vector<128xf32>
    %19 = vector.multi_reduction <add>, %18, %cst_10 [1] : vector<128x128xf32> to vector<128xf32>
    %c0_11 = arith.constant 0 : index
    %c0_12 = arith.constant 0 : index
    %20 = memref.load %arg5[%c0_11, %c0_12] : memref<1x1xf32, #tpu.memory_space<smem>>
    %21 = vector.broadcast %20 : f32 to vector<128xf32>
    %22 = arith.addf %19, %21 : vector<128xf32>
    %23 = vector.shape_cast %22 : vector<128xf32> to vector<1x128xf32>
    %c0_13 = arith.constant 0 : index
    %c0_14 = arith.constant 0 : index
    %24 = vector.load %arg6[%c0_13, %c0_14] : memref<1x128xf32, #tpu.memory_space<vmem>>, vector<1x128xf32>
    tpu.vector_store %arg6[%c0_13, %c0_14], %23 {strides = array<i32>} : memref<1x128xf32, #tpu.memory_space<vmem>>, vector<1x128xf32>,
    return
  }
  func.func @transform_0(%arg0: i32) -> (i32, i32) {
    %c0_i32 = arith.constant 0 : i32
    %c0_i32_0 = arith.constant 0 : i32
    return %arg0, %c0_i32 : i32, i32
  }
  func.func @transform_1(%arg0: i32) -> (i32, i32) {
    %c0_i32 = arith.constant 0 : i32
    %c0_i32_0 = arith.constant 0 : i32
    %c0_i32_1 = arith.constant 0 : i32
    return %c0_i32, %c0_i32_0 : i32, i32
  }
  func.func @transform_2(%arg0: i32) -> (i32, i32) {
    %c0_i32 = arith.constant 0 : i32
    %c0_i32_0 = arith.constant 0 : i32
    %c0_i32_1 = arith.constant 0 : i32
    return %c0_i32, %c0_i32_0 : i32, i32
  }
  func.func @transform_3(%arg0: i32) -> (i32, i32) {
    %c0_i32 = arith.constant 0 : i32
    %c0_i32_0 = arith.constant 0 : i32
    %c0_i32_1 = arith.constant 0 : i32
    return %c0_i32, %c0_i32_0 : i32, i32
  }
  func.func @transform_4(%arg0: i32) -> (i32, i32) {
    %c0_i32 = arith.constant 0 : i32
    %c0_i32_0 = arith.constant 0 : i32
    %c0_i32_1 = arith.constant 0 : i32
    return %c0_i32, %c0_i32_0 : i32, i32
  }
  func.func @transform_5(%arg0: i32) -> (i32, i32) {
    %c0_i32 = arith.constant 0 : i32
    %c0_i32_0 = arith.constant 0 : i32
    return %c0_i32, %arg0 : i32, i32
  }
}

</mosaic_0001>

<bundles_post_ra>
// kernel: tpu_custom_call.1
= control target key start
LH: loop header
LB: loop body
LE: loop exit
PB: predicated region body
PF: predicated region fallthrough
CT: control target
= control target key end

     0   :  { %s1483_s0 = inlined_call_operand.hbm [shape: f32[256,128], index: 0, kind: input, shape index: {}]   ;;  %s1484_s1 = inlined_call_operand.hbm [shape: bf16[128,128], index: 1, kind: input, shape index: {}]   ;;  %s1485_s2 = inlined_call_operand.vmem [shape: f32[1,128], index: 2, kind: input, shape index: {}]   ;;  %s1486_s3 = inlined_call_operand.vmem [shape: bf16[1,128], index: 3, kind: input, shape index: {}]   ;;  %s1487_s4 = inlined_call_operand.<no memory space> [shape: f32[1,1], index: 4, kind: input, shape index: {}]   ;;  %s1488_s5 = inlined_call_operand.hbm [shape: f32[1,256], index: 5, kind: output, shape index: {}]  }
   0x1   :  { %10 = sst [smem:[#allocation2]] %s1487_s4 }
   0x2   :  { %11 = vsyncpa [#allocation4], 0 }
   0x3   :  { %13 = vsyncpa [#allocation4 + $0x1], 0 }
   0x4   :  { %14 = vsyncpa [#allocation7], 0 }
   0x5   :  { %15 = vsyncpa [#allocation5], 0 }
   0x6   :  { %17 = vsyncpa [#allocation5 + $0x1], 0  ;;  %s1235_s20 = smov 0   ;;  %s1237_s21 = smov 0  }
   0x7   :  { %s1239_s22 = smov 0   ;;  %s1241_s23 = smov 0  }
   0x8 LB: > { %s1256_s4 = sadd.s32 4294967295, %s1195_s23   ;;  %s894_s24 = sadd.s32 4294967294, %s1195_s23   ;;  %s1195_s23 = sphi %s1241_s23, %s1498_s23   ;;  %s1191_s22 = sphi %s1239_s22, %s1497_s22   ;;  %s1187_s21 = sphi %s1237_s21, %s1496_s21   ;;  %s1183_s20 = sphi %s1235_s20, %s1495_s20  }
   0x9   : > { %p43_p0 = scmp.ne.s32.totalorder %s1187_s21, %s1183_s20  ;;  %p44_p1 = scmp.eq.s32.totalorder %s1256_s4, 0 }
   0xa   : > { %p151_p2 = scmp.eq.s32.totalorder %s1256_s4, 1  ;;  %p157_p3 = scmp.eq.s32.totalorder %s894_s24, 1 }
   0xb   : > { %p1265_p4 = por %p44_p1, %p43_p0  ;;  %p895_p5 = scmp.ge.s32.totalorder %s1195_s23, 1 }
   0xc   : > { %p1270_p6 = por %p157_p3, %p43_p0  ;;  %p164_p7 = scmp.lt.s32.totalorder %s1195_s23, 3 }
   0xd   : > { %s175_s29 = sshll.u32 %s1484_s1, 4  ;;  %s1197_s6 = smov [#allocation6]   ;;  %s176_s29 = int_to_ptr.hbm [resolvable:$true] %s175_s29 }
   0xe   : > { %p1278_p8 = pnand %p895_p5, %p164_p7  ;;  %s177_s7 = sshll.u32 %s1197_s6, 4  ;;  %s178_s7 = int_to_ptr.vmem [resolvable:$true] %s177_s7 }
   0xf   : > { %s1288_s8 = sadd.s32 1, %s1195_s23   ;;  %s1198_s9 = smov 64  }
  0x10   : > { %p979_p9 = pneg %p1278_p8  ;;  %s1199_s10 = smov 4  }
  0x11   : > { %s27_s11 = ssub.s32 %s1195_s23, %s1288_s8  ;;  %s30_s12 = sadd.s32 1, %s1191_s22 }
  0x12   : > { %p980_p10 = pnand %p979_p9, %p44_p1  ;;  %p28_p12 = scmp.eq.s32.totalorder %s27_s11, 0 }
  0x13   : > { %p37_p13 = scmp.ne.s32.totalorder %s1191_s22, %s1187_s21  ;;  %p38_p0 = scmp.eq.s32.totalorder %s1195_s23, 0 }
  0x14   : > { %982 = dma.hbm_to_vmem [thread:$0]  (!%p980_p10), %s176_s29, 1024, %s178_s7, [#allocation7], %s1198_s9, %s1198_s9, %s1199_s10  }
  0x15   : > { %p992_p3 = scmp.lt.s32.totalorder %s1195_s23, 2  ;;  %p39_p5 = por %p38_p0, %p37_p13 }
  0x16   : > { %s1298_s13 = scalar_select %p28_p12, %s1191_s22, %s30_s12  }
  0x17   : > { %p1302_p7 = por %p151_p2, %p37_p13  ;;  %s200_s15 = sand.u32 1, %s1191_s22  }
  0x18   : > { %s938_s16 = sshll.u32 %s1195_s23, 7  ;;  %s898_s17 = sshll.u32 %s200_s15, 7 }
  0x19   : > { %s209_s24 = scalar_lea.hbm %s1483_s0, %s938_s16  ;;  %s204_s28 = scalar_lea.vmem [#allocation3], %s898_s17 }
  0x1a   : > { %s210_s27 = sshll.u32 %s209_s24, 4  ;;  %s212_s29 = sshll.u32 %s204_s28, 4  ;;  %s211_s27 = int_to_ptr.hbm [resolvable:$true] %s210_s27  ;;  %s213_s29 = int_to_ptr.vmem [resolvable:$true] %s212_s29 }
  0x1b   : > { %p1313_p9 = pnand %p992_p3, %p39_p5  ;;  %s201_s7 = scalar_lea.sflag [#allocation4], %s200_s15 }
  0x1c   : > { %s1095_s9 = sshra.s32 %s211_s27, 4  ;;  %s1102_s16 = scalar_lea.hbm %s1483_s0, 256  ;;  %s1096_s9 = int_to_ptr.hbm [resolvable:$true] %s1095_s9 }
  0x1d   : > { %s1097_s10 = scalar_lea.hbm %s1096_s9, 128  ;;  %p1099_p10 = pneg %p1313_p9 }
  0x1e   : > { %p1098_p2 = scmp.ne.s32.totalorder %s1096_s9, %s1097_s10  ;;  %p1103_p0 = scmp.lt.s32.totalorder %s1096_s9, %s1483_s0 }
  0x1f   : > { %p1104_p3 = scmp.lt.s32.totalorder %s1102_s16, %s1097_s10 }
  0x20   : > { %p1100_p12 = pnand %p1099_p10, %p1098_p2 }
  0x21   : > { %p1105_p5 = por %p1104_p3, %p1103_p0 }
  0x22   : > { %p1101_p13 = pneg %p1100_p12 }
  0x24   : > { %p1106_p11 = pnand %p1105_p5, %p1101_p13 }
  0x26   : > { %1109 = shalt.err (!%p1106_p11)
}
  0x27   : > { %s1200_s15 = smov 128   ;;  %s1201_s19 = smov 8  }
  0x28   : > { %986 = dma.hbm_to_vmem [thread:$0]  (!%p1313_p9), %s211_s27, 2048, %s213_s29, %s201_s7, %s1200_s15, %s1200_s15, %s1201_s19  }
  0x29   : > { %224 = sbr.rel (%p1278_p8) target bundleno = 436 (0x1b4), region = 40  ;;  %s1330_s24 = sand.u32 (!%p1278_p8), 1, %s1187_s21  }
  0x2a   : > { %s902_s28 = sshll.u32 (!%p1278_p8), %s1330_s24, 7  ;;  %s227_s9 = scalar_lea.sflag (!%p1278_p8), [#allocation4], %s1330_s24 }
  0x2b   : > { %s1334_s10 = scalar_lea.vmem (!%p1278_p8), [#allocation3], %s902_s28 }
  0x2e   : > { %1170 = dma.done.wait (%p1265_p4), %s227_s9, 2048  }
  0x2f   : > { %1172 = vsyncadd (%p1265_p4), %s227_s9, 4294965248 }
  0x30   : > { %1174 = dma.done.wait (%p44_p1), [#allocation7], 1024  }
  0x31   : > { %1176 = vsyncadd (%p44_p1), [#allocation7], 4294966272  ;;  %v946_v0 = vld [vmem:[#allocation6 + $0x38] sm:$0xff]  ;;  %v945_v1 = vld [vmem:[#allocation6 + $0x30] sm:$0xff]  ;;  %s706_s6 = sld [smem:[#allocation2]]  ;;  %vm745_vm0 = vcmask 130112   ;;  %s814_s12 = scalar_lea.hbm %s1488_s5, %s1256_s4 }
  0x32   : > { %355 = vmatpush.bf16.msra.mxu0 %v946_v0  ;;  %947 = vmatpush.bf16.msra.mxu1 %v946_v0  ;;  %v944_v2 = vld [vmem:[#allocation6 + $0x28] sm:$0xff]  ;;  %v943_v3 = vld [vmem:[#allocation6 + $0x20] sm:$0xff]  ;;  %v942_v4 = vld [vmem:[#allocation6 + $0x18] sm:$0xff]  ;;  %vm749_vm1 = vcmask 195712   ;;  %vm753_vm2 = vcmask 261312   ;;  %vm757_vm3 = vcmask 326912  }
  0x33   : > { %948 = vmatpush.bf16.msra.mxu2 %v946_v0  ;;  %949 = vmatpush.bf16.msra.mxu3 %v946_v0  ;;  %v941_v5 = vld [vmem:[#allocation6 + $0x10] sm:$0xff]  ;;  %v940_v6 = vld [vmem:[#allocation6 + $0x8] sm:$0xff]  ;;  %v939_v7 = vld [vmem:[#allocation6] sm:$0xff]  ;;  %vm761_vm4 = vcmask 392512   ;;  %vm765_vm5 = vcmask 458112   ;;  %vm769_vm6 = vcmask 523712  }
  0x34   : > { %v263_v8 = vld [vmem:[%s1334_s10] sm:$0xff]  ;;  %v264_v9 = vld [vmem:[%s1334_s10 + $0x8] sm:$0xff]  ;;  %v265_v20 = vld [vmem:[%s1334_s10 + $0x10] sm:$0xff]  ;;  %vm773_vm7 = vcmask 589312   ;;  %vm777_vm8 = vcmask 654912   ;;  %vm781_vm9 = vcmask 720512  }
  0x35   : > { %v267_v10 = vld [vmem:[%s1334_s10 + $0x20] sm:$0xff]  ;;  %v268_v11 = vld [vmem:[%s1334_s10 + $0x28] sm:$0xff]  ;;  %v279_v16 = vpack.c.bf16 %v264_v9, %v263_v8  ;;  %v266_v21 = vld [vmem:[%s1334_s10 + $0x18] sm:$0xff]  ;;  %vm785_vm10 = vcmask 786112   ;;  %vm789_vm11 = vcmask 851712   ;;  %vm793_vm12 = vcmask 917312  }
  0x36   : > { %356 = vmatpush.bf16.msra.mxu0 %v945_v1  ;;  %950 = vmatpush.bf16.msra.mxu1 %v945_v1  ;;  %v271_v12 = vld [vmem:[%s1334_s10 + $0x40] sm:$0xff]  ;;  %v272_v13 = vld [vmem:[%s1334_s10 + $0x48] sm:$0xff]  ;;  %v281_v17 = vpack.c.bf16 %v268_v11, %v267_v10  ;;  %v269_v22 = vld [vmem:[%s1334_s10 + $0x30] sm:$0xff]  ;;  %v280_v28 = vpack.c.bf16 %v266_v21, %v265_v20  ;;  %vm797_vm13 = vcmask 982912   ;;  %s261_s16 = scalar_lea.vmem [#allocation8], %s1330_s24  ;;  %s818_s18 = sshll.u32 %s814_s12, 4  ;;  %s819_s18 = int_to_ptr.hbm [resolvable:$true] %s818_s18 }
  0x37   : > { %951 = vmatpush.bf16.msra.mxu2 %v945_v1  ;;  %952 = vmatpush.bf16.msra.mxu3 %v945_v1  ;;  %v275_v14 = vld [vmem:[%s1334_s10 + $0x60] sm:$0xff]  ;;  %v276_v15 = vld [vmem:[%s1334_s10 + $0x68] sm:$0xff]  ;;  %v283_v18 = vpack.c.bf16 %v272_v13, %v271_v12  ;;  %v270_v23 = vld [vmem:[%s1334_s10 + $0x38] sm:$0xff]  ;;  %s816_s17 = sshll.u32 %s261_s16, 4  ;;  %vm801_vm14 = vcmask 1048512   ;;  %s806_s4 = scalar_lea.sflag [#allocation5], %s1330_s24  ;;  %s817_s17 = int_to_ptr.vmem [resolvable:$true] %s816_s17 }
  0x38   : > { %v285_v19 = vpack.c.bf16 %v276_v15, %v275_v14  ;;  %v273_v24 = vld [vmem:[%s1334_s10 + $0x50] sm:$0xff]  ;;  %v274_v25 = vld [vmem:[%s1334_s10 + $0x58] sm:$0xff]  ;;  %v282_v29 = vpack.c.bf16 %v270_v23, %v269_v22  ;;  %v1363_v32 = vld [vmem:[%s1485_s2] ss:$0 sm:$0xff]  ;;  %s1139_s15 = sshra.s32 %s819_s18, 4  ;;  %s1140_s15 = int_to_ptr.hbm [resolvable:$true] %s1139_s15 }
  0x39   : > { %v277_v26 = vld [vmem:[%s1334_s10 + $0x70] sm:$0xff]  ;;  %v278_v27 = vld [vmem:[%s1334_s10 + $0x78] sm:$0xff]  ;;  %v284_v30 = vpack.c.bf16 %v274_v25, %v273_v24  ;;  %s1141_s19 = scalar_lea.hbm %s1140_s15, 1  ;;  %s1145_s10 = scalar_lea.hbm %s1488_s5, 2 }
  0x3a   : > { %357 = vmatpush.bf16.msra.mxu0 %v944_v2  ;;  %953 = vmatpush.bf16.msra.mxu1 %v944_v2  ;;  %v286_v31 = vpack.c.bf16 %v278_v27, %v277_v26  ;;  %p1142_p1 = scmp.ne.s32.totalorder %s1140_s15, %s1141_s19  ;;  %p1146_p11 = scmp.lt.s32.totalorder %s1140_s15, %s1488_s5 }
  0x3b   : > { %954 = vmatpush.bf16.msra.mxu2 %v944_v2  ;;  %955 = vmatpush.bf16.msra.mxu3 %v944_v2  ;;  %p1147_p9 = scmp.lt.s32.totalorder %s1145_s10, %s1141_s19 }
  0x3c   : > { %p1143_p4 = pnand %p1142_p1, %p1302_p7 }
  0x3d   : > { %p1148_p2 = por %p1147_p9, %p1146_p11 }
  0x3e   : > { %358 = vmatpush.bf16.msra.mxu0 %v943_v3  ;;  %956 = vmatpush.bf16.msra.mxu1 %v943_v3  ;;  %p1144_p8 = pneg %p1143_p4 }
  0x3f   : > { %957 = vmatpush.bf16.msra.mxu2 %v943_v3  ;;  %958 = vmatpush.bf16.msra.mxu3 %v943_v3 }
  0x40   : > { %p1149_p10 = pnand %p1148_p2, %p1144_p8 }
  0x42   : > { %359 = vmatpush.bf16.msra.mxu0 %v942_v4  ;;  %959 = vmatpush.bf16.msra.mxu1 %v942_v4 }
  0x43   : > { %960 = vmatpush.bf16.msra.mxu2 %v942_v4  ;;  %961 = vmatpush.bf16.msra.mxu3 %v942_v4 }
  0x46   : > { %360 = vmatpush.bf16.msra.mxu0 %v941_v5  ;;  %962 = vmatpush.bf16.msra.mxu1 %v941_v5 }
  0x47   : > { %963 = vmatpush.bf16.msra.mxu2 %v941_v5  ;;  %964 = vmatpush.bf16.msra.mxu3 %v941_v5 }
  0x4a   : > { %361 = vmatpush.bf16.msra.mxu0 %v940_v6  ;;  %965 = vmatpush.bf16.msra.mxu1 %v940_v6 }
  0x4b   : > { %966 = vmatpush.bf16.msra.mxu2 %v940_v6  ;;  %967 = vmatpush.bf16.msra.mxu3 %v940_v6 }
  0x4e   : > { %362 = vmatpush.bf16.msra.mxu0 %v939_v7  ;;  %968 = vmatpush.bf16.msra.mxu1 %v939_v7 }
  0x4f   : > { %969 = vmatpush.bf16.msra.mxu2 %v939_v7  ;;  %970 = vmatpush.bf16.msra.mxu3 %v939_v7 }
  0x51   : > { %363 = vmatmul.bf16.vlgmr.msra.gmra.mxu0 %v279_v16  ;;  %373 = vmatmul.bf16.vlgmr.msra.gmra.mxu1 %v281_v17 }
  0x52   : > { %383 = vmatmul.bf16.vlgmr.msra.gmra.mxu2 %v283_v18  ;;  %393 = vmatmul.bf16.vlgmr.msra.gmra.mxu3 %v285_v19 }
  0x61   : > { %368 = vmatmul.bf16.gmra.mxu0 %v280_v28  ;;  %378 = vmatmul.bf16.gmra.mxu1 %v282_v29 }
  0x62   : > { %388 = vmatmul.bf16.gmra.mxu2 %v284_v30  ;;  %398 = vmatmul.bf16.gmra.mxu3 %v286_v31 }
  0xce   : > { %v364_v33 = vpop.f32.mrf.mxu0  ;;  %v374_v34 = vpop.f32.mrf.mxu1 }
  0xcf   : > { %v365_v35 = vadd.f32 %v1363_v32, %v364_v33  ;;  %v375_v36 = vadd.f32 %v1363_v32, %v374_v34  ;;  %v612_v34 = vld [vmem:[%s1486_s3] sm:$0x1] }
  0xd1   : > { %v404_v37 = vpack.c.bf16 %v365_v35, %v365_v35  ;;  %v408_v38 = vpack.c.bf16 %v375_v36, %v375_v36 }
  0xd3   : > { %v420_v39 = vunpack.c.l.bf16 %v404_v37  ;;  %v424_v40 = vunpack.c.l.bf16 %v408_v38 }
  0xd5   : > { %v436_v41 = vmul.f32 0.5, %v420_v39  ;;  %v440_v42 = vmul.f32 0.5, %v424_v40  ;;  %v384_v43 = vpop.f32.mrf.mxu2  ;;  %v394_v44 = vpop.f32.mrf.mxu3 }
  0xd6   : > { %v366_v45 = vpop.f32.mrf.mxu0  ;;  %v376_v46 = vpop.f32.mrf.mxu1  ;;  %v385_v47 = vadd.f32 %v1363_v32, %v384_v43  ;;  %v395_v48 = vadd.f32 %v1363_v32, %v394_v44 }
  0xd7   : > { %v452_v49 = vpack.c.bf16 %v436_v41, %v436_v41  ;;  %v456_v50 = vpack.c.bf16 %v440_v42, %v440_v42  ;;  %v367_v51 = vadd.f32 %v1363_v32, %v366_v45  ;;  %v377_v52 = vadd.f32 %v1363_v32, %v376_v46 }
  0xd8   : > { %v412_v53 = vpack.c.bf16 %v385_v47, %v385_v47  ;;  %v416_v54 = vpack.c.bf16 %v395_v48, %v395_v48  ;;  %v614_v48 = vpack.i.b16 %v612_v34, %v612_v34 }
  0xd9   : > { %v468_v55 = vunpack.c.l.bf16 %v452_v49  ;;  %v472_v56 = vunpack.c.l.bf16 %v456_v50  ;;  %v405_v57 = vpack.c.bf16 %v367_v51, %v367_v51  ;;  %v409_v58 = vpack.c.bf16 %v377_v52, %v377_v52 }
  0xda   : > { %v428_v59 = vunpack.c.l.bf16 %v412_v53  ;;  %v432_v60 = vunpack.c.l.bf16 %v416_v54 }
  0xdb   : > { %v421_v61 = vunpack.c.l.bf16 %v405_v57  ;;  %v425_v62 = vunpack.c.l.bf16 %v409_v58  ;;  %1033 = vtanh.f32 %v468_v55 }
  0xdc   : > { %v444_v63 = vmul.f32 0.5, %v428_v59  ;;  %v448_v0 = vmul.f32 0.5, %v432_v60  ;;  %1035 = vtanh.f32 %v472_v56 }
  0xdd   : > { %v437_v1 = vmul.f32 0.5, %v421_v61  ;;  %v441_v2 = vmul.f32 0.5, %v425_v62  ;;  %v386_v3 = vpop.f32.mrf.mxu2  ;;  %v396_v4 = vpop.f32.mrf.mxu3 }
  0xde   : > { %v369_v5 = vpop.f32.mrf.mxu0  ;;  %v460_v6 = vpack.c.bf16 %v444_v63, %v444_v63  ;;  %v379_v7 = vpop.f32.mrf.mxu1  ;;  %v387_v8 = vadd.f32 %v1363_v32, %v386_v3  ;;  %v464_v9 = vpack.c.bf16 %v448_v0, %v448_v0  ;;  %v397_v10 = vadd.f32 %v1363_v32, %v396_v4 }
  0xdf   : > { %v453_v11 = vpack.c.bf16 %v437_v1, %v437_v1  ;;  %v457_v12 = vpack.c.bf16 %v441_v2, %v441_v2  ;;  %v370_v13 = vadd.f32 %v1363_v32, %v369_v5  ;;  %v380_v14 = vadd.f32 %v1363_v32, %v379_v7 }
  0xe0   : > { %v476_v15 = vunpack.c.l.bf16 %v460_v6  ;;  %v413_v16 = vpack.c.bf16 %v387_v8, %v387_v8  ;;  %v417_v17 = vpack.c.bf16 %v397_v10, %v397_v10  ;;  %v480_v28 = vunpack.c.l.bf16 %v464_v9 }
  0xe1   : > { %v469_v18 = vunpack.c.l.bf16 %v453_v11  ;;  %v473_v19 = vunpack.c.l.bf16 %v457_v12  ;;  %v406_v20 = vpack.c.bf16 %v370_v13, %v370_v13  ;;  %v410_v21 = vpack.c.bf16 %v380_v14, %v380_v14  ;;  %v1034_v22 = vpop.eup %1033 }
  0xe2   : > { %1037 = vtanh.f32 %v476_v15  ;;  %v429_v23 = vunpack.c.l.bf16 %v413_v16  ;;  %v433_v24 = vunpack.c.l.bf16 %v417_v17  ;;  %v1036_v25 = vpop.eup %1035  ;;  %v500_v35 = vpack.c.bf16 %v1034_v22, %v1034_v22 }
  0xe3   : > { %1039 = vtanh.f32 %v469_v18  ;;  %v422_v26 = vunpack.c.l.bf16 %v406_v20  ;;  %v426_v27 = vunpack.c.l.bf16 %v410_v21  ;;  %v504_v45 = vpack.c.bf16 %v1036_v25, %v1036_v25 }
  0xe4   : > { %1041 = vtanh.f32 %v473_v19  ;;  %v445_v29 = vmul.f32 0.5, %v429_v23  ;;  %v449_v40 = vmul.f32 0.5, %v433_v24  ;;  %v516_v55 = vunpack.c.l.bf16 %v500_v35 }
  0xe5   : > { %v438_v30 = vmul.f32 0.5, %v422_v26  ;;  %v442_v31 = vmul.f32 0.5, %v426_v27  ;;  %v389_v33 = vpop.f32.mrf.mxu2  ;;  %1043 = vtanh.f32 %v480_v28  ;;  %v520_v61 = vunpack.c.l.bf16 %v504_v45  ;;  %v399_v4 = vpop.f32.mrf.mxu3 }
  0xe6   : > { %v371_v36 = vpop.f32.mrf.mxu0  ;;  %v461_v37 = vpack.c.bf16 %v445_v29, %v445_v29  ;;  %v381_v38 = vpop.f32.mrf.mxu1  ;;  %v390_v39 = vadd.f32 %v1363_v32, %v389_v33  ;;  %v465_v60 = vpack.c.bf16 %v449_v40, %v449_v40  ;;  %v616_v63 = vperm.slane %v614_v48, 0 }
  0xe7   : > { %v454_v41 = vpack.c.bf16 %v438_v30, %v438_v30  ;;  %v372_v42 = vadd.f32 %v1363_v32, %v371_v36  ;;  %v458_v43 = vpack.c.bf16 %v442_v31, %v442_v31  ;;  %v382_v47 = vadd.f32 %v1363_v32, %v381_v38 }
  0xe8   : > { %v1038_v44 = vpop.eup %1037  ;;  %v477_v46 = vunpack.c.l.bf16 %v461_v37  ;;  %v414_v53 = vpack.c.bf16 %v390_v39, %v390_v39  ;;  %v532_v5 = vmul.f32 0.5, %v516_v55  ;;  %v481_v10 = vunpack.c.l.bf16 %v465_v60 }
  0xe9   : > { %v1040_v49 = vpop.eup %1039  ;;  %v470_v50 = vunpack.c.l.bf16 %v454_v41  ;;  %v508_v51 = vpack.c.bf16 %v1038_v44, %v1038_v44  ;;  %v407_v52 = vpack.c.bf16 %v372_v42, %v372_v42  ;;  %v474_v57 = vunpack.c.l.bf16 %v458_v43 }
  0xea   : > { %v1042_v54 = vpop.eup %1041  ;;  %v501_v56 = vpack.c.bf16 %v1040_v49, %v1040_v49  ;;  %1045 = vtanh.f32 %v477_v46  ;;  %v411_v2 = vpack.c.bf16 %v382_v47, %v382_v47  ;;  %v430_v3 = vunpack.c.l.bf16 %v414_v53 }
  0xeb   : > { %v505_v58 = vpack.c.bf16 %v1042_v54, %v1042_v54  ;;  %1047 = vtanh.f32 %v470_v50  ;;  %v524_v59 = vunpack.c.l.bf16 %v508_v51  ;;  %v423_v62 = vunpack.c.l.bf16 %v407_v52  ;;  %v1044_v0 = vpop.eup %1043 }
  0xec   : > { %1049 = vtanh.f32 %v474_v57  ;;  %v517_v6 = vunpack.c.l.bf16 %v501_v56  ;;  %v427_v9 = vunpack.c.l.bf16 %v411_v2  ;;  %v536_v12 = vmul.f32 0.5, %v520_v61 }
  0xed   : > { %v521_v1 = vunpack.c.l.bf16 %v505_v58  ;;  %v540_v7 = vmul.f32 0.5, %v524_v59  ;;  %v439_v8 = vmul.f32 0.5, %v423_v62  ;;  %v512_v14 = vpack.c.bf16 %v1044_v0, %v1044_v0  ;;  %v391_v26 = vpop.f32.mrf.mxu2  ;;  %v401_v46 = vpop.f32.mrf.mxu3 }
  0xee   : > { %v1381_v15 = vunpack.c.l.bf16 %v616_v63  ;;  %v443_v19 = vmul.f32 0.5, %v427_v9  ;;  %v446_v20 = vmul.f32 0.5, %v430_v3  ;;  %v548_v22 = vpack.c.bf16 %v532_v5, %v532_v5 }
  0xef   : > { %v455_v13 = vpack.c.bf16 %v439_v8, %v439_v8  ;;  %v537_v17 = vmul.f32 0.5, %v521_v1  ;;  %v533_v23 = vmul.f32 0.5, %v517_v6  ;;  %v556_v24 = vpack.c.bf16 %v540_v7, %v540_v7 }
  0xf0   : > { %v1046_v11 = vpop.eup %1045  ;;  %1051 = vtanh.f32 %v481_v10  ;;  %v552_v30 = vpack.c.bf16 %v536_v12, %v536_v12  ;;  %v528_v31 = vunpack.c.l.bf16 %v512_v14  ;;  %v459_v33 = vpack.c.bf16 %v443_v19, %v443_v19 }
  0xf1   : > { %v1048_v16 = vpop.eup %1047  ;;  %v509_v18 = vpack.c.bf16 %v1046_v11, %v1046_v11  ;;  %v471_v25 = vunpack.c.l.bf16 %v455_v13  ;;  %v553_v34 = vpack.c.bf16 %v537_v17, %v537_v17  ;;  %v462_v36 = vpack.c.bf16 %v446_v20, %v446_v20 }
  0xf2   : > { %v1050_v21 = vpop.eup %1049  ;;  %v502_v27 = vpack.c.bf16 %v1048_v16, %v1048_v16  ;;  %v392_v37 = vadd.f32 %v1363_v32, %v391_v26  ;;  %v1384_v38 = vunpack.c.l.bf16 %v548_v22  ;;  %v549_v39 = vpack.c.bf16 %v533_v23, %v533_v23 }
  0xf3   : > { %v506_v28 = vpack.c.bf16 %v1050_v21, %v1050_v21  ;;  %v525_v29 = vunpack.c.l.bf16 %v509_v18  ;;  %1053 = vtanh.f32 %v471_v25  ;;  %v475_v40 = vunpack.c.l.bf16 %v459_v33 }
  0xf4   : > { %v400_v41 = vadd.f32 %v1363_v32, %v399_v4  ;;  %v518_v42 = vunpack.c.l.bf16 %v502_v27  ;;  %v572_v43 = vunpack.c.l.bf16 %v556_v24  ;;  %v478_v45 = vunpack.c.l.bf16 %v462_v36 }
  0xf5   : > { %v541_v35 = vmul.f32 0.5, %v525_v29  ;;  %v522_v44 = vunpack.c.l.bf16 %v506_v28  ;;  %v568_v47 = vunpack.c.l.bf16 %v552_v30  ;;  %1055 = vtanh.f32 %v475_v40 }
  0xf6   : > { %v415_v48 = vpack.c.bf16 %v392_v37, %v392_v37  ;;  %v418_v49 = vpack.c.bf16 %v400_v41, %v400_v41  ;;  %v1052_v50 = vpop.eup %1051  ;;  %v569_v51 = vunpack.c.l.bf16 %v553_v34  ;;  %v1387_v53 = vmul.f32 0.5, %v528_v31 }
  0xf7   : > { %v557_v52 = vpack.c.bf16 %v541_v35, %v541_v35  ;;  %1057 = vtanh.f32 %v478_v45  ;;  %v565_v55 = vunpack.c.l.bf16 %v549_v39  ;;  %v402_v58 = vadd.f32 %v1363_v32, %v401_v46 }
  0xf8   : > { %v431_v56 = vunpack.c.l.bf16 %v415_v48  ;;  %v434_v57 = vunpack.c.l.bf16 %v418_v49  ;;  %v534_v59 = vmul.f32 0.5, %v518_v42  ;;  %v1390_v60 = vadd.f32 0.5, %v572_v43 }
  0xf9   : > { %v1054_v54 = vpop.eup %1053  ;;  %v538_v62 = vmul.f32 0.5, %v522_v44  ;;  %v419_v1 = vpack.c.bf16 %v402_v58, %v402_v58  ;;  %v584_v2 = vadd.f32 0.5, %v568_v47  ;;  %v573_v4 = vunpack.c.l.bf16 %v557_v52 }
  0xfa   : > { %v503_v61 = vpack.c.bf16 %v1054_v54, %v1054_v54  ;;  %v447_v63 = vmul.f32 0.5, %v431_v56  ;;  %v450_v0 = vmul.f32 0.5, %v434_v57  ;;  %v513_v5 = vpack.c.bf16 %v1052_v50, %v1052_v50 }
  0xfb   : > { %v585_v6 = vadd.f32 0.5, %v569_v51  ;;  %v1056_v7 = vpop.eup %1055  ;;  %v435_v10 = vunpack.c.l.bf16 %v419_v1  ;;  %v600_v11 = vpack.c.bf16 %v584_v2, %v584_v2  ;;  %v550_v32 = vpack.c.bf16 %v534_v59, %v534_v59 }
  0xfc   : > { %v519_v3 = vunpack.c.l.bf16 %v503_v61  ;;  %v463_v8 = vpack.c.bf16 %v447_v63, %v447_v63  ;;  %v466_v9 = vpack.c.bf16 %v450_v0, %v450_v0  ;;  %v507_v14 = vpack.c.bf16 %v1056_v7, %v1056_v7 }
  0xfd   : > { %v1058_v12 = vpop.eup %1057  ;;  %v601_v16 = vpack.c.bf16 %v585_v6, %v585_v6  ;;  %v451_v20 = vmul.f32 0.5, %v435_v10  ;;  %v554_v21 = vpack.c.bf16 %v538_v62, %v538_v62  ;;  %v589_v22 = vadd.f32 0.5, %v573_v4 }
  0xfe   : > { %v535_v13 = vmul.f32 0.5, %v519_v3  ;;  %v510_v17 = vpack.c.bf16 %v1058_v12, %v1058_v12  ;;  %v479_v18 = vunpack.c.l.bf16 %v463_v8  ;;  %v482_v19 = vunpack.c.l.bf16 %v466_v9 }
  0xff   : > { %v523_v23 = vunpack.c.l.bf16 %v507_v14  ;;  %v621_v24 = vunpack.c.l.bf16 %v600_v11  ;;  %v467_v26 = vpack.c.bf16 %v451_v20, %v451_v20  ;;  %v622_v27 = vunpack.c.l.bf16 %v601_v16 }
 0x100   : > { %v526_v25 = vunpack.c.l.bf16 %v510_v17  ;;  %1059 = vtanh.f32 %v479_v18  ;;  %v551_v28 = vpack.c.bf16 %v535_v13, %v535_v13  ;;  %v580_v35 = vadd.f32 0.5, %v1384_v38 }
 0x101   : > { %v539_v29 = vmul.f32 0.5, %v523_v23  ;;  %1061 = vtanh.f32 %v482_v19  ;;  %v638_v30 = vmul.f32 %v1381_v15, %v621_v24  ;;  %v483_v33 = vunpack.c.l.bf16 %v467_v26 }
 0x102   : > { %v542_v31 = vmul.f32 0.5, %v526_v25  ;;  %v639_v34 = vmul.f32 %v1381_v15, %v622_v27  ;;  %v529_v36 = vunpack.c.l.bf16 %v513_v5  ;;  %v581_v37 = vadd.f32 0.5, %v565_v55 }
 0x103   : > { %v604_v39 = vpack.c.bf16 %v1390_v60, %v1390_v60  ;;  %v605_v40 = vpack.c.bf16 %v589_v22, %v589_v22  ;;  %1063 = vtanh.f32 %v483_v33  ;;  %v596_v43 = vpack.c.bf16 %v580_v35, %v580_v35 }
 0x104   : > { %v558_v41 = vpack.c.bf16 %v542_v31, %v542_v31  ;;  %v652_v42 = vpack.c.bf16 %v639_v34, %v638_v30  ;;  %v566_v44 = vunpack.c.l.bf16 %v550_v32  ;;  %v567_v45 = vunpack.c.l.bf16 %v551_v28 }
 0x105   : > { %v560_v46 = vpack.c.bf16 %v1387_v53, %v1387_v53  ;;  %v597_v47 = vpack.c.bf16 %v581_v37, %v581_v37  ;;  %v555_v49 = vpack.c.bf16 %v539_v29, %v539_v29  ;;  %v617_v51 = vunpack.c.l.bf16 %v596_v43 }
 0x106   : > { %v1060_v48 = vpop.eup %1059  ;;  %v574_v50 = vunpack.c.l.bf16 %v558_v41  ;;  %v662_v38 = vunpack.c.l.bf16 %v652_v42  ;;  %v570_v54 = vunpack.c.l.bf16 %v554_v21  ;;  %v545_v55 = vmul.f32 0.5, %v529_v36 }
 0x107   : > { %v1062_v52 = vpop.eup %1061  ;;  %v511_v56 = vpack.c.bf16 %v1060_v48, %v1060_v48  ;;  %v618_v57 = vunpack.c.l.bf16 %v597_v47  ;;  %v634_v59 = vmul.f32 %v1381_v15, %v617_v51  ;;  %v625_v60 = vunpack.c.l.bf16 %v604_v39 }
 0x108   : > { %v514_v58 = vpack.c.bf16 %v1062_v52, %v1062_v52  ;;  %682 = vadd.xlane.f32.xlu2 %v662_v38  ;;  %v626_v61 = vunpack.c.l.bf16 %v605_v40  ;;  %v582_v63 = vadd.f32 0.5, %v566_v44  ;;  %v583_v0 = vadd.f32 0.5, %v567_v45 }
 0x109   : > { %v527_v62 = vunpack.c.l.bf16 %v511_v56  ;;  %v635_v53 = vmul.f32 %v1381_v15, %v618_v57  ;;  %v1064_v1 = vpop.eup %1063  ;;  %v571_v2 = vunpack.c.l.bf16 %v555_v49  ;;  %v590_v3 = vadd.f32 0.5, %v574_v50 }
 0x10a   : > { %v530_v4 = vunpack.c.l.bf16 %v514_v58  ;;  %v663_v5 = vunpack.c.h.bf16 %v652_v42  ;;  %v515_v7 = vpack.c.bf16 %v1064_v1, %v1064_v1  ;;  %v598_v9 = vpack.c.bf16 %v582_v63, %v582_v63 }
 0x10b   : > { %v543_v6 = vmul.f32 0.5, %v527_v62  ;;  %v650_v8 = vpack.c.bf16 %v635_v53, %v634_v59  ;;  %v642_v11 = vmul.f32 %v1381_v15, %v625_v60  ;;  %v643_v12 = vmul.f32 %v1381_v15, %v626_v61 }
 0x10c   : > { %v546_v10 = vmul.f32 0.5, %v530_v4  ;;  %v599_v32 = vpack.c.bf16 %v583_v0, %v583_v0  ;;  %v586_v13 = vadd.f32 0.5, %v570_v54  ;;  %v531_v16 = vunpack.c.l.bf16 %v515_v7 }
 0x10d   : > { %v559_v14 = vpack.c.bf16 %v543_v6, %v543_v6  ;;  %v658_v17 = vunpack.c.l.bf16 %v650_v8  ;;  %v561_v18 = vpack.c.bf16 %v545_v55, %v545_v55  ;;  %v619_v20 = vunpack.c.l.bf16 %v598_v9 }
 0x10e   : > { %v562_v19 = vpack.c.bf16 %v546_v10, %v546_v10  ;;  %v620_v21 = vunpack.c.l.bf16 %v599_v32  ;;  %v587_v22 = vadd.f32 0.5, %v571_v2  ;;  %v547_v24 = vmul.f32 0.5, %v531_v16 }
 0x10f   : > { %v575_v23 = vunpack.c.l.bf16 %v559_v14  ;;  %674 = vadd.xlane.f32.xlu0 %v658_v17  ;;  %v606_v25 = vpack.c.bf16 %v590_v3, %v590_v3  ;;  %v654_v27 = vpack.c.bf16 %v643_v12, %v642_v11  ;;  %v636_v28 = vmul.f32 %v1381_v15, %v619_v20 }
 0x110   : > { %v578_v26 = vunpack.c.l.bf16 %v562_v19  ;;  %684 = vadd.xlane.f32.xlu2 %v663_v5  ;;  %v637_v29 = vmul.f32 %v1381_v15, %v620_v21  ;;  %v563_v31 = vpack.c.bf16 %v547_v24, %v547_v24  ;;  %v602_v37 = vpack.c.bf16 %v586_v13, %v586_v13 }
 0x111   : > { %v591_v30 = vadd.f32 0.5, %v575_v23  ;;  %v627_v33 = vunpack.c.l.bf16 %v606_v25  ;;  %v603_v39 = vpack.c.bf16 %v587_v22, %v587_v22  ;;  %v576_v41 = vunpack.c.l.bf16 %v560_v46 }
 0x112   : > { %v594_v34 = vadd.f32 0.5, %v578_v26  ;;  %v651_v35 = vpack.c.bf16 %v637_v29, %v636_v28  ;;  %v579_v36 = vunpack.c.l.bf16 %v563_v31  ;;  %v577_v42 = vunpack.c.l.bf16 %v561_v18 }
 0x113   : > { %v607_v40 = vpack.c.bf16 %v591_v30, %v591_v30  ;;  %v666_v43 = vunpack.c.l.bf16 %v654_v27  ;;  %v659_v47 = vunpack.c.h.bf16 %v650_v8  ;;  %v644_v49 = vmul.f32 %v1381_v15, %v627_v33 }
 0x114   : > { %v660_v44 = vunpack.c.l.bf16 %v651_v35  ;;  %v595_v45 = vadd.f32 0.5, %v579_v36  ;;  %v610_v50 = vpack.c.bf16 %v594_v34, %v594_v34  ;;  %v623_v38 = vunpack.c.l.bf16 %v602_v37 }
 0x115   : > { %v628_v48 = vunpack.c.l.bf16 %v607_v40  ;;  %v624_v51 = vunpack.c.l.bf16 %v603_v39  ;;  %v592_v56 = vadd.f32 0.5, %v576_v41  ;;  %v593_v46 = vadd.f32 0.5, %v577_v42 }
 0x116   : > { %678 = vadd.xlane.f32.xlu1 %v660_v44  ;;  %v611_v54 = vpack.c.bf16 %v595_v45, %v595_v45  ;;  %v631_v55 = vunpack.c.l.bf16 %v610_v50  ;;  %v667_v59 = vunpack.c.h.bf16 %v654_v27  ;;  %v640_v60 = vmul.f32 %v1381_v15, %v623_v38 }
 0x117   : > { %676 = vadd.xlane.f32.xlu0 %v659_v47  ;;  %v645_v52 = vmul.f32 %v1381_v15, %v628_v48  ;;  %v641_v61 = vmul.f32 %v1381_v15, %v624_v51  ;;  %v661_v62 = vunpack.c.h.bf16 %v651_v35  ;;  %v608_v1 = vpack.c.bf16 %v592_v56, %v592_v56 }
 0x118   : > { %690 = vadd.xlane.f32.xlu2 %v666_v43  ;;  %v632_v58 = vunpack.c.l.bf16 %v611_v54  ;;  %v648_v63 = vmul.f32 %v1381_v15, %v631_v55  ;;  %v609_v2 = vpack.c.bf16 %v593_v46, %v593_v46  ;;  %v740_v19 = vlaneseq }
 0x119   : > { %v655_v57 = vpack.c.bf16 %v645_v52, %v644_v49  ;;  %v653_v3 = vpack.c.bf16 %v641_v61, %v640_v60  ;;  %v629_v5 = vunpack.c.l.bf16 %v608_v1  ;;  %v1415_v23 = vstv %s706_s6 }
 0x11a   : > { %v649_v0 = vmul.f32 %v1381_v15, %v632_v58  ;;  %v630_v6 = vunpack.c.l.bf16 %v609_v2  ;;  %v1413_v21 = vand.u32 127, %v740_v19 }
 0x11b   : > { %v669_v53 = vunpack.c.h.bf16 %v655_v57  ;;  %v664_v7 = vunpack.c.l.bf16 %v653_v3  ;;  %v665_v8 = vunpack.c.h.bf16 %v653_v3  ;;  %v646_v10 = vmul.f32 %v1381_v15, %v629_v5 }
 0x11c   : > { %v657_v4 = vpack.c.bf16 %v649_v0, %v648_v63  ;;  %v647_v11 = vmul.f32 %v1381_v15, %v630_v6  ;;  %v668_v32 = vunpack.c.l.bf16 %v655_v57  ;;  %v743_v24 = vadd.s32 4294967288, %v1413_v21 }
 0x11d   : > { %v747_v26 = vadd.s32 4294967280, %v1413_v21  ;;  %v751_v30 = vadd.s32 4294967272, %v1413_v21  ;;  %v755_v37 = vadd.s32 4294967264, %v1413_v21  ;;  %v759_v44 = vadd.s32 4294967256, %v1413_v21 }
 0x11e   : > { %680 = vadd.xlane.f32.xlu1 %v661_v62  ;;  %v672_v9 = vunpack.c.l.bf16 %v657_v4  ;;  %v656_v12 = vpack.c.bf16 %v647_v11, %v646_v10  ;;  %v673_v14 = vunpack.c.h.bf16 %v657_v4  ;;  %v767_v49 = vadd.s32 4294967240, %v1413_v21 }
 0x11f   : > { %692 = vadd.xlane.f32.xlu0 %v667_v59  ;;  %v763_v38 = vadd.s32 4294967248, %v1413_v21  ;;  %v771_v59 = vadd.s32 4294967232, %v1413_v21  ;;  %v775_v62 = vadd.s32 4294967224, %v1413_v21  ;;  %v779_v1 = vadd.s32 4294967216, %v1413_v21 }
 0x120   : > { %696 = vadd.xlane.f32.xlu2 %v669_v53  ;;  %v670_v13 = vunpack.c.l.bf16 %v656_v12  ;;  %v671_v16 = vunpack.c.h.bf16 %v656_v12  ;;  %v783_v6 = vadd.s32 4294967208, %v1413_v21 }
 0x126   : > { %688 = vadd.xlane.f32.xlu1 %v665_v8 }
 0x127   : > { %686 = vadd.xlane.f32.xlu0 %v664_v7 }
 0x128   : > { %702 = vadd.xlane.f32.xlu2 %v672_v9 }
 0x12e   : > { %694 = vadd.xlane.f32.xlu1 %v668_v32  ;;  %v787_v32 = vadd.s32 4294967200, %v1413_v21 }
 0x12f   : > { %698 = vadd.xlane.f32.xlu0 %v670_v13 }
 0x136   : > { %700 = vadd.xlane.f32.xlu1 %v671_v16 }
 0x137   : > { %704 = vadd.xlane.f32.xlu0 %v673_v14 }
 0x17b   : > { %v683_v17 = vpop.xlane.xlu2 %682 }
 0x17c   : > { %v712_v39 = vadd.f32 %v1415_v23, %v683_v17  ;;  %v791_v17 = vadd.s32 4294967192, %v1413_v21 }
 0x17e   : > { %v756_v48 = vperm.slane %v712_v39, %v755_v37 }
 0x182   : > { %v675_v18 = vpop.xlane.xlu0 %674 }
 0x183   : > { %v685_v15 = vpop.xlane.xlu2 %684  ;;  %v708_v28 = vadd.f32 %v1415_v23, %v675_v18  ;;  %v795_v18 = vadd.s32 4294967184, %v1413_v21 }
 0x184   : > { %v713_v45 = vadd.f32 %v1415_v23, %v685_v15 }
 0x185   : > { %v742_v34 = vperm.slane %v708_v28, %v1413_v21 }
 0x186   : > { %v760_v52 = vperm.slane %v713_v45, %v759_v44 }
 0x189   : > { %v679_v20 = vpop.xlane.xlu1 %678 }
 0x18a   : > { %v677_v22 = vpop.xlane.xlu0 %676  ;;  %v710_v27 = vadd.f32 %v1415_v23, %v679_v20 }
 0x18b   : > { %v709_v25 = vadd.f32 %v1415_v23, %v677_v22  ;;  %v691_v41 = vpop.xlane.xlu2 %690  ;;  %v799_v22 = vadd.s32 4294967176, %v1413_v21 }
 0x18c   : > { %v748_v31 = vperm.slane %v710_v27, %v747_v26  ;;  %v716_v60 = vadd.f32 %v1415_v23, %v691_v41 }
 0x18d   : > { %v744_v29 = vperm.slane %v709_v25, %v743_v24 }
 0x18e   : > { %v772_v2 = vperm.slane %v716_v60, %v771_v59 }
 0x18f   : > { %v746_v40 = vsel %vm745_vm0, %v744_v29, %v742_v34 }
 0x190   : > { %v750_v43 = vsel %vm749_vm1, %v748_v31, %v746_v40 }
 0x191   : > { %v681_v33 = vpop.xlane.xlu1 %680 }
 0x192   : > { %v693_v35 = vpop.xlane.xlu0 %692  ;;  %v711_v36 = vadd.f32 %v1415_v23, %v681_v33 }
 0x193   : > { %v697_v57 = vpop.xlane.xlu2 %696  ;;  %v717_v63 = vadd.f32 %v1415_v23, %v693_v35 }
 0x194   : > { %v752_v42 = vperm.slane %v711_v36, %v751_v30  ;;  %v719_v9 = vadd.f32 %v1415_v23, %v697_v57 }
 0x195   : > { %v776_v8 = vperm.slane %v717_v63, %v775_v62 }
 0x196   : > { %v754_v47 = vsel %vm753_vm2, %v752_v42, %v750_v43  ;;  %v784_v16 = vperm.slane %v719_v9, %v783_v6 }
 0x197   : > { %v758_v50 = vsel %vm757_vm3, %v756_v48, %v754_v47 }
 0x198   : > { %v762_v46 = vsel %vm761_vm4, %v760_v52, %v758_v50 }
 0x199   : > { %v689_v51 = vpop.xlane.xlu1 %688 }
 0x19a   : > { %v687_v54 = vpop.xlane.xlu0 %686  ;;  %v715_v55 = vadd.f32 %v1415_v23, %v689_v51 }
 0x19b   : > { %v714_v56 = vadd.f32 %v1415_v23, %v687_v54  ;;  %v703_v12 = vpop.xlane.xlu2 %702 }
 0x19c   : > { %v768_v58 = vperm.slane %v715_v55, %v767_v49  ;;  %v722_v19 = vadd.f32 %v1415_v23, %v703_v12 }
 0x19d   : > { %v764_v61 = vperm.slane %v714_v56, %v763_v38 }
 0x19e   : > { %v796_v29 = vperm.slane %v722_v19, %v795_v18 }
 0x19f   : > { %v766_v53 = vsel %vm765_vm5, %v764_v61, %v762_v46 }
 0x1a0   : > { %v770_v0 = vsel %vm769_vm6, %v768_v58, %v766_v53 }
 0x1a1   : > { %v695_v3 = vpop.xlane.xlu1 %694  ;;  %v774_v7 = vsel %vm773_vm7, %v772_v2, %v770_v0 }
 0x1a2   : > { %v699_v4 = vpop.xlane.xlu0 %698  ;;  %v718_v5 = vadd.f32 %v1415_v23, %v695_v3  ;;  %v778_v11 = vsel %vm777_vm8, %v776_v8, %v774_v7 }
 0x1a3   : > { %v720_v13 = vadd.f32 %v1415_v23, %v699_v4 }
 0x1a4   : > { %v780_v10 = vperm.slane %v718_v5, %v779_v1 }
 0x1a5   : > { %v788_v26 = vperm.slane %v720_v13, %v787_v32 }
 0x1a6   : > { %v782_v14 = vsel %vm781_vm9, %v780_v10, %v778_v11 }
 0x1a7   : > { %v786_v15 = vsel %vm785_vm10, %v784_v16, %v782_v14 }
 0x1a8   : > { %v790_v30 = vsel %vm789_vm11, %v788_v26, %v786_v15 }
 0x1a9   : > { %v701_v20 = vpop.xlane.xlu1 %700 }
 0x1aa   : > { %v705_v24 = vpop.xlane.xlu0 %704  ;;  %v721_v25 = vadd.f32 %v1415_v23, %v701_v20 }
 0x1ab   : > { %v723_v27 = vadd.f32 %v1415_v23, %v705_v24 }
 0x1ac   : > { %v792_v28 = vperm.slane %v721_v25, %v791_v17 }
 0x1ad   : > { %v800_v31 = vperm.slane %v723_v27, %v799_v22 }
 0x1ae   : > { %v794_v21 = vsel %vm793_vm12, %v792_v28, %v790_v30 }
 0x1af   : > { %v798_v33 = vsel %vm797_vm13, %v796_v29, %v794_v21 }
 0x1b0   : > { %v802_v34 = vsel %vm801_vm14, %v800_v31, %v798_v33 }
 0x1b1   : > { %804 = vst [vmem:[%s261_s16] sm:$0x1] %v802_v34 }
 0x1b2   : > { %1152 = shalt.err (!%p1149_p10)
}
 0x1b3   : > { %977 = dma.vmem_to_hbm [thread:$0]  (%p1302_p7), %s817_s17, 16, %s819_s18, %s806_s4  }
 0x1b4 PF: > { %s830_s24 = sand.u32 1, %s1183_s20   ;;  %p1494_p12 = scmp.ge.s32.totalorder %s1195_s23, 2 }
 0x1b5   : > { %s831_s27 = scalar_lea.sflag [#allocation5], %s830_s24 }
 0x1b6   : > { %p988_p13 = pnand %p1494_p12, %p1270_p6 }
 0x1b8   : > { %p989_p0 = pneg %p988_p13 }
 0x1ba   : > { %1178 = dma.done.wait (%p989_p0), %s831_s27, 16  }
 0x1bb   : > { %1180 = vsyncadd (%p989_p0), %s831_s27, 4294967280  ;;  %p20_p3 = scmp.ge.s32.totalorder %s1288_s8, 4   ;;  %s1495_s20 = smov %s1187_s21 }
 0x1bc   : > { %s1496_s21 = smov %s1191_s22  ;;  %s1497_s22 = smov %s1298_s13 }
 0x1bd   : > { %s1498_s23 = smov %s1288_s8  ;;  %22 = sbr.rel (!%p20_p3) target bundleno = 8 (0x8), region = 89 }
 0x1c2   :  { %836 = vsyncpa [#allocation4], 1 }
 0x1c3   :  { %838 = vsyncpa [#allocation4 + $0x1], 1 }
 0x1c4   :  { %839 = vsyncpa [#allocation7], 1 }
 0x1c5   :  { %840 = vsyncpa [#allocation5], 1 }
 0x1c6   :  { %842 = vsyncpa [#allocation5 + $0x1], 1 }

</bundles_post_ra>
